<compile_context>
chip_gen: v7x
topology: tpu7x:2x2x1
jax: 0.10.0
libtpu: 0.0.40
codegen_flags: <defaults>
</compile_context>

<pallas_src>
import jax
import jax.numpy as jnp
from jax.experimental import pallas as pl
from jax.experimental.pallas import tpu as pltpu


# ----------------------------------------------------------------------------
# Fused RK4 kernel (linear, autonomous f): Horner form, transposed layout
# ----------------------------------------------------------------------------
def _rk4_linear_kernel(h_ref, a_ref, xt_ref, o_ref):
    """One RK4 step of dx/dt = A @ x, computed in transposed (D, N) layout.

    h_ref  : (1,)   SMEM, step size h = end - start
    a_ref  : (N, N) VMEM, adjacency A (assumed symmetric -> A^T == A); may be
             stored as bf16 (exact for 0/1 graphs), upcast to f32 once here
    xt_ref : (D, N) VMEM, x^T   (lane axis = N -> lane-dense)
    o_ref  : (D, N) VMEM, result^T
    """
    h = h_ref[0]
    a = a_ref[...].astype(jnp.float32)   # hoisted: one read/upcast, 4 matmul uses
    xt = xt_ref[...]

    # Horner evaluation of the degree-4 RK4 polynomial.  Only the running `y`
    # (plus xt and a) is live across stages -> no k1..k4 vreg spill.
    # (A @ y)^T = y^T @ A^T = y^T @ A for symmetric A.
    y = xt
    for c in (0.25 * h, h / 3.0, 0.5 * h, h):
        y = xt + c * jnp.dot(y, a, preferred_element_type=jnp.float32)

    o_ref[...] = y.astype(o_ref.dtype)
    # TODO(synk): all four matmuls share the same (N, N) RHS; on v6e/v7x the
    # weights could be pushed once via pltpu.matmul_push_rhs / matmul_acc_lhs /
    # matmul_pop instead of being re-pushed by every jnp.dot.
    # TODO(synk): if ODEFunction ever becomes nonlinear / time-dependent, the
    # Horner form is no longer exact -- switch to explicit 3/8-rule stages
    # with an incremental output accumulator.


# ----------------------------------------------------------------------------
# VMEM budget helper
# ----------------------------------------------------------------------------
def _vmem_budget_bytes() -> int:
    """~75% of physical per-core VMEM (headroom for Mosaic internal scratch)."""
    cap = 64 * 1024 * 1024            # conservative fallback = v7x per-core
    try:
        info = pltpu.get_tpu_info()
        cap = int(getattr(info, "vmem_capacity_bytes", cap))
    except Exception:
        pass
    return (cap * 3) // 4


# ----------------------------------------------------------------------------
# ODEBlock forward: single RK4 step from `start` to `end` of dx/dt = A @ x
# ----------------------------------------------------------------------------
@jax.jit
def ode_block_forward(adj, x, start, end):
    """Equivalent of ODEBlock.forward(x, start, end) with solver='rk4'.

    `adj` must be symmetric (true for the LT-OCF graph).  It may be passed as
    bfloat16 (exact for 0/1 adjacencies) to halve its HBM DMA / VMEM
    residency; the kernel upcasts to f32 so the math is unchanged.
    """
    n, n2 = adj.shape
    assert n == n2, "adjacency must be square"
    n_x, d = x.shape
    assert n_x == n, "x rows must match number of graph nodes"
    # TODO(synk): for asymmetric adjacencies, contract A's LAST axis inside the
    # kernel via lax.dot_general(y, a, (((1,), (1,)), ((), ()))) instead of
    # relying on A^T == A (never materialize A^T in HBM).

    # Working-set check: A (+ its transient f32 upcast) + x^T + out^T +
    # the running Horner state must fit comfortably in VMEM.
    vmem_budget = _vmem_budget_bytes()
    a_item = jnp.dtype(adj.dtype).itemsize
    a_bytes = n * n * a_item
    a_upcast = n * n * 4 if a_item < 4 else 0
    state_bytes = 6 * d * n * 4          # x^T, out^T, running y, matmul temps
    footprint = a_bytes + a_upcast + state_bytes
    assert footprint + (4 << 20) <= vmem_budget, (
        "graph too large for the fully VMEM-resident RK4 kernel")
    # TODO(synk): streaming variant for large graphs: grid over >=512-lane
    # column tiles of A with pl.Buffered(2-3), bf16 A, and a 'parallel' grid
    # axis so both v7x TensorCores split the 4 full sweeps of A from HBM.

    h = (end - start).astype(jnp.float32).reshape((1,))
    xt = x.T   # (D, N): lane axis = N (multiple of 128) -> lane-dense output
    # (At demo size these two wrapper transposes cost as much as the kernel;
    #  callers keeping embeddings in (D, N) layout downstream can drop both.)

    out_t = pl.pallas_call(
        _rk4_linear_kernel,
        out_shape=jax.ShapeDtypeStruct((d, n), x.dtype),
        # No grid: single invocation, no pipeline machinery, so A and x^T are
        # allocated in VMEM exactly once (no double-buffered copies).
        in_specs=[
            pl.BlockSpec(memory_space=pltpu.MemorySpace.SMEM),   # h scalar
            pl.BlockSpec(memory_space=pltpu.MemorySpace.VMEM),   # A
            pl.BlockSpec(memory_space=pltpu.MemorySpace.VMEM),   # x^T
        ],
        out_specs=pl.BlockSpec(memory_space=pltpu.MemorySpace.VMEM),
        compiler_params=pltpu.CompilerParams(vmem_limit_bytes=vmem_budget),
    )(h, adj, xt)

    return out_t.T   # back to the module's (N, D) layout


# ----------------------------------------------------------------------------
# Reference (pure JAX, classical RK4 stages) for verification
# ----------------------------------------------------------------------------
def ode_block_forward_ref(adj, x, start, end):
    h = (end - start).astype(x.dtype)
    f = lambda y: adj @ y
    k1 = f(x)
    k2 = f(x + 0.5 * h * k1)
    k3 = f(x + 0.5 * h * k2)
    k4 = f(x + h * k3)
    return x + (h / 6.0) * (k1 + 2.0 * k2 + 2.0 * k3 + k4)


if __name__ == "__main__":
    key = jax.random.PRNGKey(0)
    k_adj, k_x = jax.random.split(key)

    N = 256   # number of graph nodes (users + items)
    D = 64    # embedding dim

    # Deterministic synthetic graph: symmetric 0/1 adjacency, no self-loops.
    # (The ODEFunction / LGConv has no learnable parameters.)
    upper = (jax.random.uniform(k_adj, (N, N)) < 0.05).astype(jnp.float32)
    upper = jnp.triu(upper, k=1)
    adj = upper + upper.T

    # Deterministic node embeddings.
    x = jax.random.normal(k_x, (N, D), dtype=jnp.float32) * 0.1

    start = jnp.float32(0.0)
    end = jnp.float32(1.0)

    ref = ode_block_forward_ref(adj, x, start, end)

    # f32 adjacency path.
    out = jax.block_until_ready(ode_block_forward(adj, x, start, end))
    assert out.shape == (N, D)
    assert jnp.allclose(out, ref, rtol=1e-4, atol=1e-4), "mismatch (f32 A)"

    # bf16 adjacency storage (exact for a 0/1 graph): halves A's HBM DMA and
    # VMEM residency; kernel upcasts to f32, so the result is unchanged.
    out_bf16a = jax.block_until_ready(
        ode_block_forward(adj.astype(jnp.bfloat16), x, start, end))
    assert jnp.allclose(out_bf16a, ref, rtol=1e-4, atol=1e-4), "mismatch (bf16 A)"

    print("KERNEL_OK")
</pallas_src>

<mosaic_0001>
module attributes {stable_mosaic.version = 11 : i64} {
  func.func @_rk4_linear_kernel(%arg0: memref<1xf32, #tpu.memory_space<smem>>, %arg1: memref<256x256xf32, #tpu.memory_space<vmem>>, %arg2: memref<64x256xf32, #tpu.memory_space<vmem>>, %arg3: memref<64x256xf32, #tpu.memory_space<vmem>>) attributes {dimension_semantics = [], scalar_prefetch = 0 : i64, scratch_operands = 0 : i64, tpu.core_type = #tpu.core_type<tc>} {
    %c0 = arith.constant 0 : index
    %0 = memref.load %arg0[%c0] : memref<1xf32, #tpu.memory_space<smem>>
    %c0_0 = arith.constant 0 : index
    %c0_1 = arith.constant 0 : index
    %1 = vector.load %arg1[%c0_0, %c0_1] : memref<256x256xf32, #tpu.memory_space<vmem>>, vector<256x256xf32>
    %c0_2 = arith.constant 0 : index
    %c0_3 = arith.constant 0 : index
    %2 = vector.load %arg2[%c0_2, %c0_3] : memref<64x256xf32, #tpu.memory_space<vmem>>, vector<64x256xf32>
    %cst = arith.constant 2.500000e-01 : f32
    %3 = arith.mulf %cst, %0 : f32
    %cst_4 = arith.constant 3.000000e+00 : f32
    %4 = arith.divf %0, %cst_4 : f32
    %cst_5 = arith.constant 5.000000e-01 : f32
    %5 = arith.mulf %cst_5, %0 : f32
    %cst_6 = arith.constant dense<0.000000e+00> : vector<64x256xf32>
    %6 = tpu.matmul %2, %1, %cst_6 {dimension_numbers = #tpu.dot_dimension_numbers<[1], [0], [0], [1], [0, 0, 1, 1], [], []>} : vector<64x256xf32>, vector<256x256xf32>, vector<64x256xf32> -> vector<64x256xf32>
    %7 = vector.broadcast %3 : f32 to vector<64x256xf32>
    %8 = arith.mulf %7, %6 : vector<64x256xf32>
    %9 = arith.addf %2, %8 : vector<64x256xf32>
    %cst_7 = arith.constant dense<0.000000e+00> : vector<64x256xf32>
    %10 = tpu.matmul %9, %1, %cst_7 {dimension_numbers = #tpu.dot_dimension_numbers<[1], [0], [0], [1], [0, 0, 1, 1], [], []>} : vector<64x256xf32>, vector<256x256xf32>, vector<64x256xf32> -> vector<64x256xf32>
    %11 = vector.broadcast %4 : f32 to vector<64x256xf32>
    %12 = arith.mulf %11, %10 : vector<64x256xf32>
    %13 = arith.addf %2, %12 : vector<64x256xf32>
    %cst_8 = arith.constant dense<0.000000e+00> : vector<64x256xf32>
    %14 = tpu.matmul %13, %1, %cst_8 {dimension_numbers = #tpu.dot_dimension_numbers<[1], [0], [0], [1], [0, 0, 1, 1], [], []>} : vector<64x256xf32>, vector<256x256xf32>, vector<64x256xf32> -> vector<64x256xf32>
    %15 = vector.broadcast %5 : f32 to vector<64x256xf32>
    %16 = arith.mulf %15, %14 : vector<64x256xf32>
    %17 = arith.addf %2, %16 : vector<64x256xf32>
    %cst_9 = arith.constant dense<0.000000e+00> : vector<64x256xf32>
    %18 = tpu.matmul %17, %1, %cst_9 {dimension_numbers = #tpu.dot_dimension_numbers<[1], [0], [0], [1], [0, 0, 1, 1], [], []>} : vector<64x256xf32>, vector<256x256xf32>, vector<64x256xf32> -> vector<64x256xf32>
    %19 = vector.broadcast %0 : f32 to vector<64x256xf32>
    %20 = arith.mulf %19, %18 : vector<64x256xf32>
    %21 = arith.addf %2, %20 : vector<64x256xf32>
    %c0_10 = arith.constant 0 : index
    %c0_11 = arith.constant 0 : index
    %22 = vector.load %arg3[%c0_10, %c0_11] : memref<64x256xf32, #tpu.memory_space<vmem>>, vector<64x256xf32>
    tpu.vector_store %arg3[%c0_10, %c0_11], %21 {strides = array<i32>} : memref<64x256xf32, #tpu.memory_space<vmem>>, vector<64x256xf32>,
    return
  }
}

</mosaic_0001>

<bundles_post_ra>
// kernel: ode_block_forward.1
= control target key start
LH: loop header
LB: loop body
LE: loop exit
PB: predicated region body
PF: predicated region fallthrough
CT: control target
= control target key end

     0   :  { %9 = vsyncpa [#allocation4], 0  ;;  %s1485_s0 = inlined_call_operand.<no memory space> [shape: f32[1], index: 0, kind: input, shape index: {}]   ;;  %s1486_s1 = inlined_call_operand.hbm [shape: f32[256,256], index: 1, kind: input, shape index: {}]   ;;  %s1487_s2 = inlined_call_operand.hbm [shape: f32[64,256], index: 2, kind: input, shape index: {}]   ;;  %s1488_s3 = inlined_call_operand.hbm [shape: f32[64,256], index: 3, kind: output, shape index: {}]  }
   0x1   :  { %10 = vsyncpa [#allocation7], 0 }
   0x2   :  { %11 = vsyncpa [#allocation5], 0  ;;  %s1081_s12 = smov [#allocation3]   ;;  %s1009_s16 = scalar_lea.hbm %s1486_s1, 8192 }
   0x3   :  { %s19_s13 = sshll.u32 %s1081_s12, 4  ;;  %p1010_p0 = scmp.ne.s32.totalorder %s1486_s1, %s1009_s16  ;;  %s20_s13 = int_to_ptr.vmem [resolvable:$true] %s19_s13 }
   0x4   :  { %p1013_p1 = scmp.lt.u32.totalorder %s1009_s16, %s1486_s1 }
   0x6   :  { %p1015_p2 = pnand %p1013_p1, %p1010_p0 }
   0x8   :  { %1018 = shalt.err (!%p1015_p2)
}
   0x9   :  { %s1019_s21 = scalar_lea.vmem %s20_s13, 8192  ;;  %p1024_p4 = scmp.lt.s32.totalorder %s20_s13, %s20_s13 }
   0xa   :  { %p1020_p3 = scmp.ne.s32.totalorder %s20_s13, %s1019_s21  ;;  %p1025_p5 = scmp.lt.s32.totalorder %s1019_s21, %s1019_s21 }
   0xc   :  { %p1026_p6 = por %p1025_p5, %p1024_p4 }
   0xe   :  { %p1027_p7 = pnand %p1026_p6, %p1020_p3 }
  0x10   :  { %1030 = shalt.err (!%p1027_p7)
}
  0x11   :  { %s1082_s22 = smov 256   ;;  %s1083_s23 = smov 16  }
  0x12   :  { %25 = dma.hbm_to_vmem [thread:$0]  %s1486_s1, 8192, %s20_s13, [#allocation4], %s1082_s22, %s1082_s22, %s1083_s23  }
  0x13   :  { %s1084_s26 = smov [#allocation6]   ;;  %s1031_s30 = scalar_lea.hbm %s1487_s2, 2048 }
  0x14   :  { %s31_s27 = sshll.u32 %s1084_s26, 4  ;;  %p1032_p8 = scmp.ne.s32.totalorder %s1487_s2, %s1031_s30  ;;  %s32_s27 = int_to_ptr.vmem [resolvable:$true] %s31_s27 }
  0x15   :  { %p1035_p9 = scmp.lt.u32.totalorder %s1031_s30, %s1487_s2 }
  0x17   :  { %p1037_p10 = pnand %p1035_p9, %p1032_p8 }
  0x19   :  { %1040 = shalt.err (!%p1037_p10)
}
  0x1a   :  { %s1041_s8 = scalar_lea.vmem %s32_s27, 2048  ;;  %p1046_p12 = scmp.lt.s32.totalorder %s32_s27, %s32_s27 }
  0x1b   :  { %p1042_p11 = scmp.ne.s32.totalorder %s32_s27, %s1041_s8  ;;  %p1047_p13 = scmp.lt.s32.totalorder %s1041_s8, %s1041_s8 }
  0x1d   :  { %p1048_p0 = por %p1047_p13, %p1046_p12 }
  0x1f   :  { %p1049_p1 = pnand %p1048_p0, %p1042_p11 }
  0x21   :  { %1052 = shalt.err (!%p1049_p1)
}
  0x22   :  { %37 = dma.hbm_to_vmem [thread:$0]  %s1487_s2, 2048, %s32_s27, [#allocation7], %s1082_s22, %s1082_s22, %s1083_s23  }
  0x23   :  { %1075 = dma.done.wait [#allocation4], 8192  }
  0x24   :  { %1076 = vsyncadd [#allocation4], 4294959104 }
  0x25   :  { %1077 = dma.done.wait [#allocation7], 2048  }
  0x26   :  { %1078 = vsyncadd [#allocation7], 4294965248  ;;  %v46_v0 = vld [vmem:[#allocation3 + $0x8] sm:$0xff]  ;;  %v48_v1 = vld [vmem:[#allocation3 + $0x18] sm:$0xff]  ;;  %s125_s11 = smul.f32 0.25, %s1485_s0 }
  0x27   :  { %v45_v2 = vld [vmem:[#allocation3] sm:$0xff]  ;;  %v1136_v3 = vpack.c.bf16 %v48_v1, %v46_v0  ;;  %v47_v4 = vld [vmem:[#allocation3 + $0x10] sm:$0xff]  ;;  %v50_v5 = vld [vmem:[#allocation3 + $0x28] sm:$0xff]  ;;  %s128_s14 = smul.f32 0.33333334, %s1485_s0 }
  0x28   :  { %v52_v6 = vld [vmem:[#allocation3 + $0x38] sm:$0xff]  ;;  %v1138_v7 = vpack.c.bf16 %v47_v4, %v45_v2  ;;  %v49_v9 = vld [vmem:[#allocation3 + $0x20] sm:$0xff]  ;;  %v51_v10 = vld [vmem:[#allocation3 + $0x30] sm:$0xff]  ;;  %s129_s17 = smul.f32 0.5, %s1485_s0 }
  0x29   :  { %v1140_v8 = vpack.c.bf16 %v52_v6, %v50_v5  ;;  %v54_v11 = vld [vmem:[#allocation3 + $0x48] sm:$0xff]  ;;  %749 = vmatprep.subr.bf16.mxu0 %v1136_v3  ;;  %v56_v12 = vld [vmem:[#allocation3 + $0x58] sm:$0xff]  ;;  %813 = vmatprep.subr.bf16.mxu1 %v1136_v3  ;;  %v1145_v13 = vpack.c.bf16 %v51_v10, %v49_v9  ;;  %v53_v15 = vld [vmem:[#allocation3 + $0x40] sm:$0xff] }
  0x2a   :  { %751 = vmatpush1.bf16.msra.mxu0 %v1138_v7  ;;  %815 = vmatpush1.bf16.msra.mxu1 %v1138_v7  ;;  %v1149_v14 = vpack.c.bf16 %v56_v12, %v54_v11  ;;  %v55_v16 = vld [vmem:[#allocation3 + $0x50] sm:$0xff]  ;;  %v58_v17 = vld [vmem:[#allocation3 + $0x68] sm:$0xff]  ;;  %v60_v18 = vld [vmem:[#allocation3 + $0x78] sm:$0xff] }
  0x2b   :  { %753 = vmatprep.subr.bf16.mxu0 %v1140_v8  ;;  %817 = vmatprep.subr.bf16.mxu1 %v1140_v8  ;;  %v1153_v19 = vpack.c.bf16 %v55_v16, %v53_v15  ;;  %v1157_v20 = vpack.c.bf16 %v60_v18, %v58_v17  ;;  %v57_v21 = vld [vmem:[#allocation3 + $0x60] sm:$0xff]  ;;  %v59_v22 = vld [vmem:[#allocation3 + $0x70] sm:$0xff]  ;;  %v62_v23 = vld [vmem:[#allocation3 + $0x88] sm:$0xff] }
  0x2c   :  { %v64_v24 = vld [vmem:[#allocation3 + $0x98] sm:$0xff]  ;;  %v1161_v25 = vpack.c.bf16 %v59_v22, %v57_v21  ;;  %v61_v27 = vld [vmem:[#allocation3 + $0x80] sm:$0xff]  ;;  %v63_v28 = vld [vmem:[#allocation3 + $0x90] sm:$0xff] }
  0x2d   :  { %v1165_v26 = vpack.c.bf16 %v64_v24, %v62_v23  ;;  %v66_v29 = vld [vmem:[#allocation3 + $0xa8] sm:$0xff]  ;;  %v68_v30 = vld [vmem:[#allocation3 + $0xb8] sm:$0xff]  ;;  %v1169_v31 = vpack.c.bf16 %v63_v28, %v61_v27  ;;  %v65_v33 = vld [vmem:[#allocation3 + $0xa0] sm:$0xff] }
  0x2e   :  { %755 = vmatpush1.bf16.msra.mxu0 %v1145_v13  ;;  %819 = vmatpush1.bf16.msra.mxu1 %v1145_v13  ;;  %v1173_v32 = vpack.c.bf16 %v68_v30, %v66_v29  ;;  %v67_v34 = vld [vmem:[#allocation3 + $0xb0] sm:$0xff]  ;;  %v70_v35 = vld [vmem:[#allocation3 + $0xc8] sm:$0xff]  ;;  %v72_v36 = vld [vmem:[#allocation3 + $0xd8] sm:$0xff] }
  0x2f   :  { %757 = vmatprep.subr.bf16.mxu0 %v1149_v14  ;;  %821 = vmatprep.subr.bf16.mxu1 %v1149_v14  ;;  %v1177_v37 = vpack.c.bf16 %v67_v34, %v65_v33  ;;  %v1181_v38 = vpack.c.bf16 %v72_v36, %v70_v35  ;;  %v69_v39 = vld [vmem:[#allocation3 + $0xc0] sm:$0xff]  ;;  %v71_v40 = vld [vmem:[#allocation3 + $0xd0] sm:$0xff]  ;;  %v1183_v41 = vld [vmem:[#allocation6 + $0x8] sm:$0xff] }
  0x30   :  { %v74_v42 = vld [vmem:[#allocation3 + $0xe8] sm:$0xff]  ;;  %v76_v43 = vld [vmem:[#allocation3 + $0xf8] sm:$0xff]  ;;  %194 = vmatprep.mubr.f32.mxu0 %v1183_v41  ;;  %v1188_v44 = vpack.c.bf16 %v71_v40, %v69_v39  ;;  %v73_v46 = vld [vmem:[#allocation3 + $0xe0] sm:$0xff] }
  0x31   :  { %v1192_v45 = vpack.c.bf16 %v76_v43, %v74_v42  ;;  %v75_v47 = vld [vmem:[#allocation3 + $0xf0] sm:$0xff]  ;;  %v78_v48 = vld [vmem:[#allocation3 + $0x108] sm:$0xff]  ;;  %v80_v49 = vld [vmem:[#allocation3 + $0x118] sm:$0xff] }
  0x32   :  { %759 = vmatpush1.bf16.msra.mxu0 %v1153_v19  ;;  %823 = vmatpush1.bf16.msra.mxu1 %v1153_v19  ;;  %v1196_v50 = vpack.c.bf16 %v75_v47, %v73_v46  ;;  %v1200_v51 = vpack.c.bf16 %v80_v49, %v78_v48  ;;  %v77_v52 = vld [vmem:[#allocation3 + $0x100] sm:$0xff]  ;;  %v79_v53 = vld [vmem:[#allocation3 + $0x110] sm:$0xff]  ;;  %v82_v54 = vld [vmem:[#allocation3 + $0x128] sm:$0xff] }
  0x33   :  { %761 = vmatprep.subr.bf16.mxu0 %v1157_v20  ;;  %825 = vmatprep.subr.bf16.mxu1 %v1157_v20  ;;  %v84_v55 = vld [vmem:[#allocation3 + $0x138] sm:$0xff]  ;;  %v1204_v56 = vpack.c.bf16 %v79_v53, %v77_v52  ;;  %v81_v58 = vld [vmem:[#allocation3 + $0x120] sm:$0xff]  ;;  %v83_v59 = vld [vmem:[#allocation3 + $0x130] sm:$0xff] }
  0x34   :  { %v1208_v57 = vpack.c.bf16 %v84_v55, %v82_v54  ;;  %v86_v60 = vld [vmem:[#allocation3 + $0x148] sm:$0xff]  ;;  %v88_v61 = vld [vmem:[#allocation3 + $0x158] sm:$0xff]  ;;  %v1212_v62 = vpack.c.bf16 %v83_v59, %v81_v58  ;;  %v85_v0 = vld [vmem:[#allocation3 + $0x140] sm:$0xff] }
  0x35   :  { %v1216_v63 = vpack.c.bf16 %v88_v61, %v86_v60  ;;  %v87_v1 = vld [vmem:[#allocation3 + $0x150] sm:$0xff]  ;;  %v90_v2 = vld [vmem:[#allocation3 + $0x168] sm:$0xff]  ;;  %v92_v4 = vld [vmem:[#allocation3 + $0x178] sm:$0xff] }
  0x36   :  { %763 = vmatpush1.bf16.msra.mxu0 %v1161_v25  ;;  %827 = vmatpush1.bf16.msra.mxu1 %v1161_v25  ;;  %v1220_v5 = vpack.c.bf16 %v87_v1, %v85_v0  ;;  %v1224_v6 = vpack.c.bf16 %v92_v4, %v90_v2  ;;  %v89_v9 = vld [vmem:[#allocation3 + $0x160] sm:$0xff]  ;;  %v91_v10 = vld [vmem:[#allocation3 + $0x170] sm:$0xff]  ;;  %v94_v11 = vld [vmem:[#allocation3 + $0x188] sm:$0xff] }
  0x37   :  { %765 = vmatprep.subr.bf16.mxu0 %v1165_v26  ;;  %829 = vmatprep.subr.bf16.mxu1 %v1165_v26  ;;  %v96_v12 = vld [vmem:[#allocation3 + $0x198] sm:$0xff]  ;;  %v1228_v15 = vpack.c.bf16 %v91_v10, %v89_v9  ;;  %v93_v17 = vld [vmem:[#allocation3 + $0x180] sm:$0xff]  ;;  %v95_v18 = vld [vmem:[#allocation3 + $0x190] sm:$0xff]  ;;  %v1348_v10 = vstv %s125_s11 }
  0x38   :  { %v1232_v16 = vpack.c.bf16 %v96_v12, %v94_v11  ;;  %v98_v21 = vld [vmem:[#allocation3 + $0x1a8] sm:$0xff]  ;;  %v100_v22 = vld [vmem:[#allocation3 + $0x1b8] sm:$0xff]  ;;  %v1236_v23 = vpack.c.bf16 %v95_v18, %v93_v17  ;;  %v97_v27 = vld [vmem:[#allocation3 + $0x1a0] sm:$0xff] }
  0x39   :  { %v1240_v24 = vpack.c.bf16 %v100_v22, %v98_v21  ;;  %v99_v28 = vld [vmem:[#allocation3 + $0x1b0] sm:$0xff]  ;;  %v102_v29 = vld [vmem:[#allocation3 + $0x1c8] sm:$0xff]  ;;  %v104_v30 = vld [vmem:[#allocation3 + $0x1d8] sm:$0xff] }
  0x3a   :  { %767 = vmatpush1.bf16.msra.mxu0 %v1169_v31  ;;  %831 = vmatpush1.bf16.msra.mxu1 %v1169_v31  ;;  %v1244_v33 = vpack.c.bf16 %v99_v28, %v97_v27  ;;  %v1248_v34 = vpack.c.bf16 %v104_v30, %v102_v29  ;;  %v101_v35 = vld [vmem:[#allocation3 + $0x1c0] sm:$0xff]  ;;  %v103_v36 = vld [vmem:[#allocation3 + $0x1d0] sm:$0xff]  ;;  %v106_v39 = vld [vmem:[#allocation3 + $0x1e8] sm:$0xff] }
  0x3b   :  { %769 = vmatprep.subr.bf16.mxu0 %v1173_v32  ;;  %833 = vmatprep.subr.bf16.mxu1 %v1173_v32  ;;  %v108_v40 = vld [vmem:[#allocation3 + $0x1f8] sm:$0xff]  ;;  %v1252_v42 = vpack.c.bf16 %v103_v36, %v101_v35  ;;  %v105_v46 = vld [vmem:[#allocation3 + $0x1e0] sm:$0xff]  ;;  %v107_v47 = vld [vmem:[#allocation3 + $0x1f0] sm:$0xff] }
  0x3c   :  { %v1256_v43 = vpack.c.bf16 %v108_v40, %v106_v39  ;;  %v1260_v48 = vpack.c.bf16 %v107_v47, %v105_v46  ;;  %v1266_v49 = vld [vmem:[#allocation6] sm:$0xff]  ;;  %v1269_v52 = vld [vmem:[#allocation6 + $0x18] sm:$0xff]  ;;  %v1275_v53 = vld [vmem:[#allocation6 + $0x10] sm:$0xff] }
  0x3d   :  { %v1278_v54 = vld [vmem:[#allocation6 + $0x28] sm:$0xff]  ;;  %v1283_v55 = vld [vmem:[#allocation6 + $0x20] sm:$0xff]  ;;  %v1291_v58 = vld [vmem:[#allocation6 + $0x30] sm:$0xff] }
  0x3e   :  { %771 = vmatpush1.bf16.msra.mxu0 %v1177_v37  ;;  %835 = vmatpush1.bf16.msra.mxu1 %v1177_v37  ;;  %v1294_v59 = vld [vmem:[#allocation6 + $0x48] sm:$0xff]  ;;  %v1299_v60 = vld [vmem:[#allocation6 + $0x40] sm:$0xff]  ;;  %v1302_v61 = vld [vmem:[#allocation6 + $0x58] sm:$0xff] }
  0x3f   :  { %773 = vmatprep.subr.bf16.mxu0 %v1181_v38  ;;  %837 = vmatprep.subr.bf16.mxu1 %v1181_v38  ;;  %v1307_v0 = vld [vmem:[#allocation6 + $0x50] sm:$0xff]  ;;  %v1310_v1 = vld [vmem:[#allocation6 + $0x68] sm:$0xff]  ;;  %v1315_v2 = vld [vmem:[#allocation6 + $0x60] sm:$0xff] }
  0x40   :  { %v1318_v4 = vld [vmem:[#allocation6 + $0x78] sm:$0xff]  ;;  %v1323_v9 = vld [vmem:[#allocation6 + $0x70] sm:$0xff] }
  0x42   :  { %775 = vmatpush1.bf16.msra.mxu0 %v1188_v44  ;;  %839 = vmatpush1.bf16.msra.mxu1 %v1188_v44 }
  0x43   :  { %777 = vmatprep.subr.bf16.mxu0 %v1192_v45  ;;  %841 = vmatprep.subr.bf16.mxu1 %v1192_v45 }
  0x46   :  { %779 = vmatpush1.bf16.msra.mxu0 %v1196_v50  ;;  %843 = vmatpush1.bf16.msra.mxu1 %v1196_v50 }
  0x47   :  { %781 = vmatprep.subr.bf16.mxu0 %v1200_v51  ;;  %845 = vmatprep.subr.bf16.mxu1 %v1200_v51 }
  0x4a   :  { %783 = vmatpush1.bf16.msra.mxu0 %v1204_v56  ;;  %847 = vmatpush1.bf16.msra.mxu1 %v1204_v56 }
  0x4b   :  { %785 = vmatprep.subr.bf16.mxu0 %v1208_v57  ;;  %849 = vmatprep.subr.bf16.mxu1 %v1208_v57 }
  0x4e   :  { %787 = vmatpush1.bf16.msra.mxu0 %v1212_v62  ;;  %851 = vmatpush1.bf16.msra.mxu1 %v1212_v62 }
  0x4f   :  { %789 = vmatprep.subr.bf16.mxu0 %v1216_v63  ;;  %853 = vmatprep.subr.bf16.mxu1 %v1216_v63 }
  0x52   :  { %791 = vmatpush1.bf16.msra.mxu0 %v1220_v5  ;;  %855 = vmatpush1.bf16.msra.mxu1 %v1220_v5 }
  0x53   :  { %793 = vmatprep.subr.bf16.mxu0 %v1224_v6  ;;  %857 = vmatprep.subr.bf16.mxu1 %v1224_v6 }
  0x56   :  { %795 = vmatpush1.bf16.msra.mxu0 %v1228_v15  ;;  %859 = vmatpush1.bf16.msra.mxu1 %v1228_v15 }
  0x57   :  { %797 = vmatprep.subr.bf16.mxu0 %v1232_v16  ;;  %861 = vmatprep.subr.bf16.mxu1 %v1232_v16 }
  0x5a   :  { %799 = vmatpush1.bf16.msra.mxu0 %v1236_v23  ;;  %863 = vmatpush1.bf16.msra.mxu1 %v1236_v23 }
  0x5b   :  { %801 = vmatprep.subr.bf16.mxu0 %v1240_v24  ;;  %865 = vmatprep.subr.bf16.mxu1 %v1240_v24 }
  0x5e   :  { %803 = vmatpush1.bf16.msra.mxu0 %v1244_v33  ;;  %867 = vmatpush1.bf16.msra.mxu1 %v1244_v33 }
  0x5f   :  { %805 = vmatprep.subr.bf16.mxu0 %v1248_v34  ;;  %869 = vmatprep.subr.bf16.mxu1 %v1248_v34 }
  0x62   :  { %807 = vmatpush1.bf16.msra.mxu0 %v1252_v42  ;;  %871 = vmatpush1.bf16.msra.mxu1 %v1252_v42 }
  0x63   :  { %809 = vmatprep.subr.bf16.mxu0 %v1256_v43  ;;  %873 = vmatprep.subr.bf16.mxu1 %v1256_v43 }
  0x66   :  { %811 = vmatpush1.bf16.msra.mxu0 %v1260_v48  ;;  %875 = vmatpush1.bf16.msra.mxu1 %v1260_v48 }
  0x67   :  { %877 = vmatprep.subr.bf16.mxu0 %v1136_v3  ;;  %941 = vmatprep.subr.bf16.mxu1 %v1136_v3  ;;  %v1286_v3 = vld [vmem:[#allocation6 + $0x38] sm:$0xff] }
  0x69   :  { %195 = vmatmul.mubr.f32.vlgmr.msra.gmra.mrb[0].mxu0 %v1266_v49 }
  0x6a   :  { %200 = vmatprep.mubr.f32.mxu0 %v1269_v52  ;;  %879 = vmatpush1.bf16.msra.mxu0 %v1138_v7 }
  0x6b   :  { %881 = vmatprep.subr.bf16.mxu0 %v1140_v8 }
  0x6d   :  { %201 = vmatmul.mubr.f32.gmra.mrb[2].mxu0 %v1275_v53 }
  0x6e   :  { %206 = vmatprep.mubr.f32.mxu0 %v1278_v54  ;;  %883 = vmatpush1.bf16.msra.mxu0 %v1145_v13 }
  0x6f   :  { %885 = vmatprep.subr.bf16.mxu0 %v1149_v14 }
  0x71   :  { %207 = vmatmul.mubr.f32.gmra.mrb[4].mxu0 %v1283_v55 }
  0x72   :  { %212 = vmatprep.mubr.f32.mxu0 %v1286_v3  ;;  %887 = vmatpush1.bf16.msra.mxu0 %v1153_v19 }
  0x73   :  { %889 = vmatprep.subr.bf16.mxu0 %v1157_v20 }
  0x75   :  { %213 = vmatmul.mubr.f32.gmra.mrb[6].mxu0 %v1291_v58 }
  0x76   :  { %218 = vmatprep.mubr.f32.mxu0 %v1294_v59  ;;  %891 = vmatpush1.bf16.msra.mxu0 %v1161_v25 }
  0x77   :  { %893 = vmatprep.subr.bf16.mxu0 %v1165_v26 }
  0x79   :  { %219 = vmatmul.mubr.f32.gmra.mrb[8].mxu0 %v1299_v60 }
  0x7a   :  { %224 = vmatprep.mubr.f32.mxu0 %v1302_v61  ;;  %895 = vmatpush1.bf16.msra.mxu0 %v1169_v31 }
  0x7b   :  { %897 = vmatprep.subr.bf16.mxu0 %v1173_v32 }
  0x7d   :  { %225 = vmatmul.mubr.f32.gmra.mrb[10].mxu0 %v1307_v0 }
  0x7e   :  { %230 = vmatprep.mubr.f32.mxu0 %v1310_v1  ;;  %899 = vmatpush1.bf16.msra.mxu0 %v1177_v37 }
  0x7f   :  { %901 = vmatprep.subr.bf16.mxu0 %v1181_v38 }
  0x81   :  { %231 = vmatmul.mubr.f32.gmra.mrb[12].mxu0 %v1315_v2 }
  0x82   :  { %236 = vmatprep.mubr.f32.mxu0 %v1318_v4  ;;  %903 = vmatpush1.bf16.msra.mxu0 %v1188_v44 }
  0x83   :  { %905 = vmatprep.subr.bf16.mxu0 %v1192_v45 }
  0x85   :  { %237 = vmatmul.mubr.f32.gmra.mrb[14].mxu0 %v1323_v9 }
  0x86   :  { %907 = vmatpush1.bf16.msra.mxu0 %v1196_v50 }
  0x87   :  { %909 = vmatprep.subr.bf16.mxu0 %v1200_v51 }
  0x8a   :  { %911 = vmatpush1.bf16.msra.mxu0 %v1204_v56 }
  0x8b   :  { %913 = vmatprep.subr.bf16.mxu0 %v1208_v57 }
  0x8e   :  { %915 = vmatpush1.bf16.msra.mxu0 %v1212_v62 }
  0x8f   :  { %917 = vmatprep.subr.bf16.mxu0 %v1216_v63 }
  0x92   :  { %919 = vmatpush1.bf16.msra.mxu0 %v1220_v5 }
  0x93   :  { %921 = vmatprep.subr.bf16.mxu0 %v1224_v6 }
  0x96   :  { %923 = vmatpush1.bf16.msra.mxu0 %v1228_v15 }
  0x97   :  { %925 = vmatprep.subr.bf16.mxu0 %v1232_v16 }
  0x9a   :  { %927 = vmatpush1.bf16.msra.mxu0 %v1236_v23 }
  0x9b   :  { %929 = vmatprep.subr.bf16.mxu0 %v1240_v24 }
  0x9e   :  { %931 = vmatpush1.bf16.msra.mxu0 %v1244_v33 }
  0x9f   :  { %933 = vmatprep.subr.bf16.mxu0 %v1248_v34 }
  0xa2   :  { %935 = vmatpush1.bf16.msra.mxu0 %v1252_v42 }
  0xa3   :  { %937 = vmatprep.subr.bf16.mxu0 %v1256_v43 }
  0xa6   :  { %939 = vmatpush1.bf16.msra.mxu0 %v1260_v48 }
 0x13c   :  { %v196_v11 = vpop.f32.mrb[0].mxu0 }
 0x13d   :  { %v244_v12 = vmul.f32 %v1348_v10, %v196_v11  ;;  %v198_v17 = vpop.f32.mrb[1].mxu0 }
 0x13e   :  { %v245_v18 = vmul.f32 %v1348_v10, %v198_v17 }
 0x13f   :  { %v260_v27 = vadd.f32 %v244_v12, %v1266_v49 }
 0x140   :  { %v202_v21 = vpop.f32.mrb[2].mxu0  ;;  %v261_v22 = vadd.f32 %v245_v18, %v1183_v41 }
 0x141   :  { %v246_v28 = vmul.f32 %v1348_v10, %v202_v21  ;;  %v204_v29 = vpop.f32.mrb[3].mxu0 }
 0x142   :  { %v247_v30 = vmul.f32 %v1348_v10, %v204_v29  ;;  %340 = vmatprep.mubr.f32.mxu1 %v261_v22 }
 0x143   :  { %341 = vmatmul.mubr.f32.vlgmr.msra.gmra.mrb[0].mxu1 %v260_v27  ;;  %v262_v39 = vadd.f32 %v246_v28, %v1275_v53 }
 0x144   :  { %v263_v35 = vadd.f32 %v247_v30, %v1269_v52  ;;  %v208_v36 = vpop.f32.mrb[4].mxu0  ;;  %943 = vmatpush1.bf16.msra.mxu1 %v1138_v7 }
 0x145   :  { %v248_v40 = vmul.f32 %v1348_v10, %v208_v36  ;;  %v210_v46 = vpop.f32.mrb[5].mxu0  ;;  %945 = vmatprep.subr.bf16.mxu1 %v1140_v8 }
 0x146   :  { %v249_v47 = vmul.f32 %v1348_v10, %v210_v46  ;;  %346 = vmatprep.mubr.f32.mxu1 %v263_v35 }
 0x147   :  { %347 = vmatmul.mubr.f32.gmra.mrb[2].mxu1 %v262_v39  ;;  %v264_v17 = vadd.f32 %v248_v40, %v1283_v55 }
 0x148   :  { %v265_v11 = vadd.f32 %v249_v47, %v1278_v54  ;;  %v214_v12 = vpop.f32.mrb[6].mxu0  ;;  %947 = vmatpush1.bf16.msra.mxu1 %v1145_v13 }
 0x149   :  { %v250_v7 = vmul.f32 %v1348_v10, %v214_v12  ;;  %v216_v18 = vpop.f32.mrb[7].mxu0  ;;  %949 = vmatprep.subr.bf16.mxu1 %v1149_v14 }
 0x14a   :  { %v251_v21 = vmul.f32 %v1348_v10, %v216_v18  ;;  %352 = vmatprep.mubr.f32.mxu1 %v265_v11 }
 0x14b   :  { %353 = vmatmul.mubr.f32.gmra.mrb[4].mxu1 %v264_v17  ;;  %v266_v27 = vadd.f32 %v250_v7, %v1291_v58 }
 0x14c   :  { %v267_v8 = vadd.f32 %v251_v21, %v1286_v3  ;;  %v220_v22 = vpop.f32.mrb[8].mxu0  ;;  %951 = vmatpush1.bf16.msra.mxu1 %v1153_v19 }
 0x14d   :  { %v252_v13 = vmul.f32 %v1348_v10, %v220_v22  ;;  %v222_v28 = vpop.f32.mrb[9].mxu0  ;;  %953 = vmatprep.subr.bf16.mxu1 %v1157_v20 }
 0x14e   :  { %v253_v29 = vmul.f32 %v1348_v10, %v222_v28  ;;  %358 = vmatprep.mubr.f32.mxu1 %v267_v8 }
 0x14f   :  { %359 = vmatmul.mubr.f32.gmra.mrb[6].mxu1 %v266_v27  ;;  %v268_v35 = vadd.f32 %v252_v13, %v1299_v60 }
 0x150   :  { %v269_v14 = vadd.f32 %v253_v29, %v1294_v59  ;;  %v226_v30 = vpop.f32.mrb[10].mxu0  ;;  %955 = vmatpush1.bf16.msra.mxu1 %v1161_v25 }
 0x151   :  { %v254_v19 = vmul.f32 %v1348_v10, %v226_v30  ;;  %v228_v36 = vpop.f32.mrb[11].mxu0  ;;  %957 = vmatprep.subr.bf16.mxu1 %v1165_v26 }
 0x152   :  { %v255_v39 = vmul.f32 %v1348_v10, %v228_v36  ;;  %364 = vmatprep.mubr.f32.mxu1 %v269_v14 }
 0x153   :  { %365 = vmatmul.mubr.f32.gmra.mrb[8].mxu1 %v268_v35  ;;  %v270_v46 = vadd.f32 %v254_v19, %v1307_v0 }
 0x154   :  { %v271_v20 = vadd.f32 %v255_v39, %v1302_v61  ;;  %v232_v40 = vpop.f32.mrb[12].mxu0  ;;  %959 = vmatpush1.bf16.msra.mxu1 %v1169_v31 }
 0x155   :  { %v256_v25 = vmul.f32 %v1348_v10, %v232_v40  ;;  %v234_v47 = vpop.f32.mrb[13].mxu0  ;;  %961 = vmatprep.subr.bf16.mxu1 %v1173_v32 }
 0x156   :  { %v257_v11 = vmul.f32 %v1348_v10, %v234_v47  ;;  %370 = vmatprep.mubr.f32.mxu1 %v271_v20 }
 0x157   :  { %371 = vmatmul.mubr.f32.gmra.mrb[10].mxu1 %v270_v46  ;;  %v272_v17 = vadd.f32 %v256_v25, %v1315_v2 }
 0x158   :  { %v273_v26 = vadd.f32 %v257_v11, %v1310_v1  ;;  %v238_v12 = vpop.f32.mrb[14].mxu0  ;;  %963 = vmatpush1.bf16.msra.mxu1 %v1177_v37  ;;  %v389_v37 = vstv %s128_s14 }
 0x159   :  { %v258_v31 = vmul.f32 %v1348_v10, %v238_v12  ;;  %v240_v7 = vpop.f32.mrb[15].mxu0  ;;  %965 = vmatprep.subr.bf16.mxu1 %v1181_v38 }
 0x15a   :  { %v259_v18 = vmul.f32 %v1348_v10, %v240_v7  ;;  %376 = vmatprep.mubr.f32.mxu1 %v273_v26 }
 0x15b   :  { %377 = vmatmul.mubr.f32.gmra.mrb[12].mxu1 %v272_v17  ;;  %v274_v21 = vadd.f32 %v258_v31, %v1323_v9 }
 0x15c   :  { %v275_v32 = vadd.f32 %v259_v18, %v1318_v4  ;;  %967 = vmatpush1.bf16.msra.mxu1 %v1188_v44 }
 0x15d   :  { %969 = vmatprep.subr.bf16.mxu1 %v1192_v45 }
 0x15e   :  { %382 = vmatprep.mubr.f32.mxu1 %v275_v32 }
 0x15f   :  { %383 = vmatmul.mubr.f32.gmra.mrb[14].mxu1 %v274_v21 }
 0x160   :  { %971 = vmatpush1.bf16.msra.mxu1 %v1196_v50 }
 0x161   :  { %973 = vmatprep.subr.bf16.mxu1 %v1200_v51 }
 0x164   :  { %975 = vmatpush1.bf16.msra.mxu1 %v1204_v56 }
 0x165   :  { %977 = vmatprep.subr.bf16.mxu1 %v1208_v57 }
 0x168   :  { %979 = vmatpush1.bf16.msra.mxu1 %v1212_v62 }
 0x169   :  { %981 = vmatprep.subr.bf16.mxu1 %v1216_v63 }
 0x16c   :  { %983 = vmatpush1.bf16.msra.mxu1 %v1220_v5 }
 0x16d   :  { %985 = vmatprep.subr.bf16.mxu1 %v1224_v6 }
 0x170   :  { %987 = vmatpush1.bf16.msra.mxu1 %v1228_v15 }
 0x171   :  { %989 = vmatprep.subr.bf16.mxu1 %v1232_v16 }
 0x174   :  { %991 = vmatpush1.bf16.msra.mxu1 %v1236_v23 }
 0x175   :  { %993 = vmatprep.subr.bf16.mxu1 %v1240_v24 }
 0x178   :  { %995 = vmatpush1.bf16.msra.mxu1 %v1244_v33 }
 0x179   :  { %997 = vmatprep.subr.bf16.mxu1 %v1248_v34 }
 0x17c   :  { %999 = vmatpush1.bf16.msra.mxu1 %v1252_v42 }
 0x17d   :  { %1001 = vmatprep.subr.bf16.mxu1 %v1256_v43 }
 0x180   :  { %1003 = vmatpush1.bf16.msra.mxu1 %v1260_v48 }
 0x216   :  { %v342_v38 = vpop.f32.mrb[0].mxu1 }
 0x217   :  { %v390_v44 = vmul.f32 %v389_v37, %v342_v38  ;;  %v344_v45 = vpop.f32.mrb[1].mxu1 }
 0x218   :  { %v391_v50 = vmul.f32 %v389_v37, %v344_v45 }
 0x219   :  { %v406_v57 = vadd.f32 %v390_v44, %v1266_v49  ;;  %v535_v44 = vstv %s129_s17 }
 0x21a   :  { %v407_v51 = vadd.f32 %v391_v50, %v1183_v41  ;;  %v348_v56 = vpop.f32.mrb[2].mxu1 }
 0x21b   :  { %v392_v62 = vmul.f32 %v389_v37, %v348_v56  ;;  %v350_v63 = vpop.f32.mrb[3].mxu1 }
 0x21c   :  { %v393_v5 = vmul.f32 %v389_v37, %v350_v63  ;;  %486 = vmatprep.mubr.f32.mxu0 %v407_v51 }
 0x21d   :  { %487 = vmatmul.mubr.f32.vlgmr.msra.gmra.mrb[16].mxu0 %v406_v57  ;;  %v408_v16 = vadd.f32 %v392_v62, %v1275_v53 }
 0x21e   :  { %v409_v6 = vadd.f32 %v393_v5, %v1269_v52  ;;  %v354_v15 = vpop.f32.mrb[4].mxu1 }
 0x21f   :  { %v394_v23 = vmul.f32 %v389_v37, %v354_v15  ;;  %v356_v24 = vpop.f32.mrb[5].mxu1 }
 0x220   :  { %v395_v33 = vmul.f32 %v389_v37, %v356_v24  ;;  %492 = vmatprep.mubr.f32.mxu0 %v409_v6 }
 0x221   :  { %493 = vmatmul.mubr.f32.gmra.mrb[18].mxu0 %v408_v16  ;;  %v410_v43 = vadd.f32 %v394_v23, %v1283_v55 }
 0x222   :  { %v411_v34 = vadd.f32 %v395_v33, %v1278_v54  ;;  %v360_v42 = vpop.f32.mrb[6].mxu1 }
 0x223   :  { %v396_v48 = vmul.f32 %v389_v37, %v360_v42  ;;  %v362_v10 = vpop.f32.mrb[7].mxu1 }
 0x224   :  { %v397_v8 = vmul.f32 %v389_v37, %v362_v10  ;;  %498 = vmatprep.mubr.f32.mxu0 %v411_v34 }
 0x225   :  { %499 = vmatmul.mubr.f32.gmra.mrb[20].mxu0 %v410_v43  ;;  %v412_v13 = vadd.f32 %v396_v48, %v1291_v58 }
 0x226   :  { %v413_v22 = vadd.f32 %v397_v8, %v1286_v3  ;;  %v366_v27 = vpop.f32.mrb[8].mxu1 }
 0x227   :  { %v398_v28 = vmul.f32 %v389_v37, %v366_v27  ;;  %v368_v29 = vpop.f32.mrb[9].mxu1 }
 0x228   :  { %v399_v14 = vmul.f32 %v389_v37, %v368_v29  ;;  %504 = vmatprep.mubr.f32.mxu0 %v413_v22 }
 0x229   :  { %505 = vmatmul.mubr.f32.gmra.mrb[22].mxu0 %v412_v13  ;;  %v414_v19 = vadd.f32 %v398_v28, %v1299_v60 }
 0x22a   :  { %v415_v30 = vadd.f32 %v399_v14, %v1294_v59  ;;  %v372_v35 = vpop.f32.mrb[10].mxu1 }
 0x22b   :  { %v400_v36 = vmul.f32 %v389_v37, %v372_v35  ;;  %v374_v39 = vpop.f32.mrb[11].mxu1 }
 0x22c   :  { %v401_v20 = vmul.f32 %v389_v37, %v374_v39  ;;  %510 = vmatprep.mubr.f32.mxu0 %v415_v30 }
 0x22d   :  { %511 = vmatmul.mubr.f32.gmra.mrb[24].mxu0 %v414_v19  ;;  %v416_v25 = vadd.f32 %v400_v36, %v1307_v0 }
 0x22e   :  { %v417_v40 = vadd.f32 %v401_v20, %v1302_v61  ;;  %v378_v46 = vpop.f32.mrb[12].mxu1 }
 0x22f   :  { %v402_v47 = vmul.f32 %v389_v37, %v378_v46  ;;  %v380_v11 = vpop.f32.mrb[13].mxu1 }
 0x230   :  { %v403_v26 = vmul.f32 %v389_v37, %v380_v11  ;;  %516 = vmatprep.mubr.f32.mxu0 %v417_v40 }
 0x231   :  { %517 = vmatmul.mubr.f32.gmra.mrb[26].mxu0 %v416_v25  ;;  %v418_v31 = vadd.f32 %v402_v47, %v1315_v2 }
 0x232   :  { %v419_v12 = vadd.f32 %v403_v26, %v1310_v1  ;;  %v384_v17 = vpop.f32.mrb[14].mxu1 }
 0x233   :  { %v404_v7 = vmul.f32 %v389_v37, %v384_v17  ;;  %v386_v18 = vpop.f32.mrb[15].mxu1 }
 0x234   :  { %v405_v32 = vmul.f32 %v389_v37, %v386_v18  ;;  %522 = vmatprep.mubr.f32.mxu0 %v419_v12 }
 0x235   :  { %523 = vmatmul.mubr.f32.gmra.mrb[28].mxu0 %v418_v31  ;;  %v420_v38 = vadd.f32 %v404_v7, %v1323_v9 }
 0x236   :  { %v421_v21 = vadd.f32 %v405_v32, %v1318_v4 }
 0x238   :  { %528 = vmatprep.mubr.f32.mxu0 %v421_v21 }
 0x239   :  { %529 = vmatmul.mubr.f32.gmra.mrb[30].mxu0 %v420_v38 }
 0x2f0   :  { %v488_v45 = vpop.f32.mrb[16].mxu0 }
 0x2f1   :  { %v536_v50 = vmul.f32 %v535_v44, %v488_v45  ;;  %v490_v51 = vpop.f32.mrb[17].mxu0 }
 0x2f2   :  { %v537_v56 = vmul.f32 %v535_v44, %v490_v51 }
 0x2f3   :  { %v552_v62 = vadd.f32 %v536_v50, %v1266_v49  ;;  %v681_v50 = vstv %s1485_s0  ;;  %s1085_s0 = smov [#allocation8]  }
 0x2f4   :  { %v553_v57 = vadd.f32 %v537_v56, %v1183_v41  ;;  %v494_v37 = vpop.f32.mrb[18].mxu0  ;;  %s735_s20 = sshll.u32 %s1085_s0, 4  ;;  %s736_s20 = int_to_ptr.vmem [resolvable:$true] %s735_s20 }
 0x2f5   :  { %v538_v63 = vmul.f32 %v535_v44, %v494_v37  ;;  %v496_v5 = vpop.f32.mrb[19].mxu0  ;;  %s1053_s21 = scalar_lea.vmem %s736_s20, 2048  ;;  %p1058_p3 = scmp.lt.s32.totalorder %s736_s20, %s736_s20 }
 0x2f6   :  { %v539_v6 = vmul.f32 %v535_v44, %v496_v5  ;;  %632 = vmatprep.mubr.f32.mxu1 %v553_v57  ;;  %p1054_p2 = scmp.ne.s32.totalorder %s736_s20, %s1053_s21  ;;  %p1059_p4 = scmp.lt.s32.totalorder %s1053_s21, %s1053_s21 }
 0x2f7   :  { %633 = vmatmul.mubr.f32.vlgmr.msra.gmra.mrb[16].mxu1 %v552_v62  ;;  %v554_v23 = vadd.f32 %v538_v63, %v1275_v53 }
 0x2f8   :  { %v555_v15 = vadd.f32 %v539_v6, %v1269_v52  ;;  %v500_v16 = vpop.f32.mrb[20].mxu0  ;;  %p1060_p5 = por %p1059_p4, %p1058_p3 }
 0x2f9   :  { %v540_v24 = vmul.f32 %v535_v44, %v500_v16  ;;  %v502_v33 = vpop.f32.mrb[21].mxu0 }
 0x2fa   :  { %v541_v34 = vmul.f32 %v535_v44, %v502_v33  ;;  %638 = vmatprep.mubr.f32.mxu1 %v555_v15  ;;  %p1061_p6 = pnand %p1060_p5, %p1054_p2 }
 0x2fb   :  { %639 = vmatmul.mubr.f32.gmra.mrb[18].mxu1 %v554_v23  ;;  %v556_v48 = vadd.f32 %v540_v24, %v1283_v55 }
 0x2fc   :  { %v557_v42 = vadd.f32 %v541_v34, %v1278_v54  ;;  %v506_v43 = vpop.f32.mrb[22].mxu0 }
 0x2fd   :  { %v542_v10 = vmul.f32 %v535_v44, %v506_v43  ;;  %v508_v8 = vpop.f32.mrb[23].mxu0 }
 0x2fe   :  { %v543_v22 = vmul.f32 %v535_v44, %v508_v8  ;;  %644 = vmatprep.mubr.f32.mxu1 %v557_v42 }
 0x2ff   :  { %645 = vmatmul.mubr.f32.gmra.mrb[20].mxu1 %v556_v48  ;;  %v558_v28 = vadd.f32 %v542_v10, %v1291_v58 }
 0x300   :  { %v559_v27 = vadd.f32 %v543_v22, %v1286_v3  ;;  %v512_v13 = vpop.f32.mrb[24].mxu0 }
 0x301   :  { %v544_v29 = vmul.f32 %v535_v44, %v512_v13  ;;  %v514_v14 = vpop.f32.mrb[25].mxu0 }
 0x302   :  { %v545_v30 = vmul.f32 %v535_v44, %v514_v14  ;;  %650 = vmatprep.mubr.f32.mxu1 %v559_v27 }
 0x303   :  { %651 = vmatmul.mubr.f32.gmra.mrb[22].mxu1 %v558_v28  ;;  %v560_v36 = vadd.f32 %v544_v29, %v1299_v60 }
 0x304   :  { %v561_v35 = vadd.f32 %v545_v30, %v1294_v59  ;;  %v518_v19 = vpop.f32.mrb[26].mxu0 }
 0x305   :  { %v546_v39 = vmul.f32 %v535_v44, %v518_v19  ;;  %v520_v20 = vpop.f32.mrb[27].mxu0 }
 0x306   :  { %v547_v40 = vmul.f32 %v535_v44, %v520_v20  ;;  %656 = vmatprep.mubr.f32.mxu1 %v561_v35 }
 0x307   :  { %657 = vmatmul.mubr.f32.gmra.mrb[24].mxu1 %v560_v36  ;;  %v562_v47 = vadd.f32 %v546_v39, %v1307_v0 }
 0x308   :  { %v563_v46 = vadd.f32 %v547_v40, %v1302_v61  ;;  %v524_v25 = vpop.f32.mrb[28].mxu0 }
 0x309   :  { %v548_v11 = vmul.f32 %v535_v44, %v524_v25  ;;  %v526_v26 = vpop.f32.mrb[29].mxu0 }
 0x30a   :  { %v549_v12 = vmul.f32 %v535_v44, %v526_v26  ;;  %662 = vmatprep.mubr.f32.mxu1 %v563_v46 }
 0x30b   :  { %663 = vmatmul.mubr.f32.gmra.mrb[26].mxu1 %v562_v47  ;;  %v564_v7 = vadd.f32 %v548_v11, %v1315_v2 }
 0x30c   :  { %v565_v17 = vadd.f32 %v549_v12, %v1310_v1  ;;  %v530_v31 = vpop.f32.mrb[30].mxu0 }
 0x30d   :  { %v550_v18 = vmul.f32 %v535_v44, %v530_v31  ;;  %v532_v32 = vpop.f32.mrb[31].mxu0 }
 0x30e   :  { %v551_v21 = vmul.f32 %v535_v44, %v532_v32  ;;  %668 = vmatprep.mubr.f32.mxu1 %v565_v17 }
 0x30f   :  { %669 = vmatmul.mubr.f32.gmra.mrb[28].mxu1 %v564_v7  ;;  %v566_v45 = vadd.f32 %v550_v18, %v1323_v9 }
 0x310   :  { %v567_v38 = vadd.f32 %v551_v21, %v1318_v4 }
 0x312   :  { %674 = vmatprep.mubr.f32.mxu1 %v567_v38 }
 0x313   :  { %675 = vmatmul.mubr.f32.gmra.mrb[30].mxu1 %v566_v45 }
 0x3ca   :  { %v634_v51 = vpop.f32.mrb[16].mxu1 }
 0x3cb   :  { %v682_v56 = vmul.f32 %v681_v50, %v634_v51  ;;  %v636_v57 = vpop.f32.mrb[17].mxu1 }
 0x3cc   :  { %v683_v37 = vmul.f32 %v681_v50, %v636_v57 }
 0x3cd   :  { %v698_v62 = vadd.f32 %v682_v56, %v1266_v49 }
 0x3ce   :  { %v699_v44 = vadd.f32 %v683_v37, %v1183_v41  ;;  %v640_v63 = vpop.f32.mrb[18].mxu1 }
 0x3cf   :  { %714 = vst [vmem:[#allocation8] sm:$0xff] %v698_v62  ;;  %v684_v5 = vmul.f32 %v681_v50, %v640_v63  ;;  %v642_v6 = vpop.f32.mrb[19].mxu1 }
 0x3d0   :  { %715 = vst [vmem:[#allocation8 + $0x8] sm:$0xff] %v699_v44  ;;  %v685_v15 = vmul.f32 %v681_v50, %v642_v6 }
 0x3d1   :  { %v700_v16 = vadd.f32 %v684_v5, %v1275_v53 }
 0x3d2   :  { %v701_v23 = vadd.f32 %v685_v15, %v1269_v52  ;;  %v646_v24 = vpop.f32.mrb[20].mxu1 }
 0x3d3   :  { %716 = vst [vmem:[#allocation8 + $0x10] sm:$0xff] %v700_v16  ;;  %v686_v33 = vmul.f32 %v681_v50, %v646_v24  ;;  %v648_v34 = vpop.f32.mrb[21].mxu1 }
 0x3d4   :  { %717 = vst [vmem:[#allocation8 + $0x18] sm:$0xff] %v701_v23  ;;  %v687_v42 = vmul.f32 %v681_v50, %v648_v34 }
 0x3d5   :  { %v702_v49 = vadd.f32 %v686_v33, %v1283_v55 }
 0x3d6   :  { %v703_v41 = vadd.f32 %v687_v42, %v1278_v54  ;;  %v652_v43 = vpop.f32.mrb[22].mxu1 }
 0x3d7   :  { %718 = vst [vmem:[#allocation8 + $0x20] sm:$0xff] %v702_v49  ;;  %v688_v48 = vmul.f32 %v681_v50, %v652_v43  ;;  %v654_v10 = vpop.f32.mrb[23].mxu1 }
 0x3d8   :  { %719 = vst [vmem:[#allocation8 + $0x28] sm:$0xff] %v703_v41  ;;  %v689_v8 = vmul.f32 %v681_v50, %v654_v10 }
 0x3d9   :  { %v704_v53 = vadd.f32 %v688_v48, %v1291_v58 }
 0x3da   :  { %v705_v52 = vadd.f32 %v689_v8, %v1286_v3  ;;  %v658_v22 = vpop.f32.mrb[24].mxu1 }
 0x3db   :  { %720 = vst [vmem:[#allocation8 + $0x30] sm:$0xff] %v704_v53  ;;  %v690_v27 = vmul.f32 %v681_v50, %v658_v22  ;;  %v660_v13 = vpop.f32.mrb[25].mxu1 }
 0x3dc   :  { %721 = vst [vmem:[#allocation8 + $0x38] sm:$0xff] %v705_v52  ;;  %v691_v28 = vmul.f32 %v681_v50, %v660_v13 }
 0x3dd   :  { %v706_v55 = vadd.f32 %v690_v27, %v1299_v60 }
 0x3de   :  { %v707_v54 = vadd.f32 %v691_v28, %v1294_v59  ;;  %v664_v29 = vpop.f32.mrb[26].mxu1 }
 0x3df   :  { %722 = vst [vmem:[#allocation8 + $0x40] sm:$0xff] %v706_v55  ;;  %v692_v14 = vmul.f32 %v681_v50, %v664_v29  ;;  %v666_v30 = vpop.f32.mrb[27].mxu1 }
 0x3e0   :  { %723 = vst [vmem:[#allocation8 + $0x48] sm:$0xff] %v707_v54  ;;  %v693_v35 = vmul.f32 %v681_v50, %v666_v30 }
 0x3e1   :  { %v708_v58 = vadd.f32 %v692_v14, %v1307_v0 }
 0x3e2   :  { %v709_v3 = vadd.f32 %v693_v35, %v1302_v61  ;;  %v670_v19 = vpop.f32.mrb[28].mxu1 }
 0x3e3   :  { %724 = vst [vmem:[#allocation8 + $0x50] sm:$0xff] %v708_v58  ;;  %v694_v36 = vmul.f32 %v681_v50, %v670_v19  ;;  %v672_v39 = vpop.f32.mrb[29].mxu1 }
 0x3e4   :  { %725 = vst [vmem:[#allocation8 + $0x58] sm:$0xff] %v709_v3  ;;  %v695_v20 = vmul.f32 %v681_v50, %v672_v39 }
 0x3e5   :  { %v710_v60 = vadd.f32 %v694_v36, %v1315_v2 }
 0x3e6   :  { %v711_v59 = vadd.f32 %v695_v20, %v1310_v1  ;;  %v676_v40 = vpop.f32.mrb[30].mxu1 }
 0x3e7   :  { %726 = vst [vmem:[#allocation8 + $0x60] sm:$0xff] %v710_v60  ;;  %v696_v46 = vmul.f32 %v681_v50, %v676_v40  ;;  %v678_v25 = vpop.f32.mrb[31].mxu1 }
 0x3e8   :  { %727 = vst [vmem:[#allocation8 + $0x68] sm:$0xff] %v711_v59  ;;  %v697_v0 = vmul.f32 %v681_v50, %v678_v25 }
 0x3e9   :  { %v712_v61 = vadd.f32 %v696_v46, %v1323_v9 }
 0x3ea   :  { %v713_v47 = vadd.f32 %v697_v0, %v1318_v4 }
 0x3eb   :  { %728 = vst [vmem:[#allocation8 + $0x70] sm:$0xff] %v712_v61 }
 0x3ec   :  { %729 = vst [vmem:[#allocation8 + $0x78] sm:$0xff] %v713_v47 }
 0x3ed   :  { %1064 = shalt.err (!%p1061_p6)
}
 0x3ee   :  { %s1065_s26 = scalar_lea.hbm %s1488_s3, 2048 }
 0x3ef   :  { %p1066_p7 = scmp.ne.s32.totalorder %s1488_s3, %s1065_s26  ;;  %p1069_p8 = scmp.lt.u32.totalorder %s1065_s26, %s1488_s3 }
 0x3f1   :  { %p1071_p9 = pnand %p1069_p8, %p1066_p7 }
 0x3f3   :  { %1074 = shalt.err (!%p1071_p9)
}
 0x3f4   :  { %741 = dma.vmem_to_hbm [thread:$0]  %s736_s20, 2048, %s1488_s3, [#allocation5], %s1082_s22, %s1082_s22, %s1083_s23  }
 0x3f5   :  { %1079 = dma.done.wait [#allocation5], 2048  }
 0x3f6   :  { %1080 = vsyncadd [#allocation5], 4294965248 }
 0x3f7   :  { %745 = vsyncpa [#allocation4], 1 }
 0x3f8   :  { %746 = vsyncpa [#allocation7], 1 }
 0x3f9   :  { %747 = vsyncpa [#allocation5], 1 }

</bundles_post_ra>
